<compile_context>
chip_gen: v6e
topology: v6e:2x2x1
jax: 0.10.0
libtpu: 0.0.40
codegen_flags: <defaults>
</compile_context>

<pallas_src>
import functools

import jax
import jax.numpy as jnp
from jax.experimental import pallas as pl
from jax.experimental.pallas import tpu as pltpu


def _label_smoothing_kernel(preds_ref, target_ref, weight_ref, out_ref, acc_ref,
                            *, smoothing, n_valid, n_classes, tile_n):
    i = pl.program_id(0)

    # --- init running sums on the first grid step ---
    @pl.when(i == 0)
    def _():
        acc_ref[0] = 0.0   # sum_i ( -sum_c logp[i, c] )
        acc_ref[1] = 0.0   # sum_i ( -w[t_i] * logp[i, t_i] )
        acc_ref[2] = 0.0   # sum_i (  w[t_i] )

    x = preds_ref[...].astype(jnp.float32)    # (C, TN)  classes x samples
    t = target_ref[...]                        # (1, TN)  int32
    w = weight_ref[...].astype(jnp.float32)    # (C, 1)

    # Valid-sample mask along the lane axis (N is padded up to a multiple of TN).
    col = jax.lax.broadcasted_iota(jnp.int32, (1, tile_n), 1) + i * tile_n
    validf = (col < n_valid).astype(jnp.float32)                    # (1, TN)

    # Per-sample log-softmax stats over the class (sublane) axis; no (C, TN) logp tensor.
    m = jnp.max(x, axis=0, keepdims=True)                            # (1, TN)
    lse = jnp.log(jnp.sum(jnp.exp(x - m), axis=0, keepdims=True))    # (1, TN)
    sum_x = jnp.sum(x, axis=0, keepdims=True)                        # (1, TN)

    # -sum_c logp[c, i] == C * (m_i + lse_i) - sum_c x[c, i]
    row_neg_sum = n_classes * (m + lse) - sum_x                      # (1, TN)

    # Masked gather of x at the target class and of the class weight.
    rows = jax.lax.broadcasted_iota(jnp.int32, x.shape, 0)           # (C, TN)
    sel = rows == t                                                  # (C, TN) bool
    x_t = jnp.sum(jnp.where(sel, x, 0.0), axis=0, keepdims=True)     # (1, TN)  x[t_i, i]
    w_t = jnp.sum(jnp.where(sel, w, 0.0), axis=0, keepdims=True)     # (1, TN)  weight[t_i]
    neg_logp_t = (m + lse) - x_t                                     # -logp[t_i, i]

    acc_ref[0] += jnp.sum(row_neg_sum * validf)
    acc_ref[1] += jnp.sum(w_t * neg_logp_t * validf)
    acc_ref[2] += jnp.sum(w_t * validf)

    # --- finalize on the last grid step ---
    @pl.when(i == pl.num_programs(0) - 1)
    def _():
        loss = acc_ref[0] / n_valid                 # mean over rows
        nll = acc_ref[1] / acc_ref[2]               # weighted-mean NLL
        out_ref[0, 0] = smoothing * (loss / n_classes) + (1.0 - smoothing) * nll


def label_smoothing_loss(preds, target, weight, smoothing=0.1, tile_n=4096):
    """preds: (N, C) float (any dtype), target: (N,) int, weight: (C,) float. Returns scalar f32."""
    n, c = preds.shape

    # Lane-dense layout: classes on the sublane axis, samples on the lane axis.
    x = preds.T                                     # (C, N), native dtype (no f32 pre-cast)
    t = target.reshape(1, n).astype(jnp.int32)      # (1, N)
    w = weight.reshape(c, 1).astype(jnp.float32)    # (C, 1)

    # Tile N on the lane axis (multiple of 128); pad N up to a multiple of the tile.
    tn = min(tile_n, pl.cdiv(n, 128) * 128)
    n_pad = pl.cdiv(n, tn) * tn
    if n_pad != n:
        x = jnp.pad(x, ((0, 0), (0, n_pad - n)))
        t = jnp.pad(t, ((0, 0), (0, n_pad - n)))
    grid = (n_pad // tn,)

    kernel = functools.partial(
        _label_smoothing_kernel,
        smoothing=float(smoothing), n_valid=n, n_classes=c, tile_n=tn)

    out = pl.pallas_call(
        kernel,
        out_shape=jax.ShapeDtypeStruct((1, 1), jnp.float32),
        grid=grid,
        in_specs=[
            pl.BlockSpec((c, tn), lambda i: (0, i)),    # preds tile (classes x samples)
            pl.BlockSpec((1, tn), lambda i: (0, i)),    # target tile
            pl.BlockSpec((c, 1), lambda i: (0, 0)),     # class weights, resident every step
        ],
        out_specs=pl.BlockSpec((1, 1), lambda i: (0, 0),
                               memory_space=pltpu.MemorySpace.SMEM),
        scratch_shapes=[pltpu.SMEM((3,), jnp.float32)],
        compiler_params=pltpu.CompilerParams(
            dimension_semantics=("arbitrary",)),        # running-sum reduction over the grid
    )(x, t, w)
    return out[0, 0]


def _reference(preds, target, weight, smoothing=0.1):
    logp = jax.nn.log_softmax(preds.astype(jnp.float32), axis=-1)
    n_classes = preds.shape[-1]
    loss = jnp.mean(-jnp.sum(logp, axis=-1))
    w_t = weight[target]
    picked = jnp.take_along_axis(logp, target[:, None], axis=-1)[:, 0]
    nll = jnp.sum(-w_t * picked) / jnp.sum(w_t)
    return smoothing * (loss / n_classes) + (1.0 - smoothing) * nll


if __name__ == "__main__":
    key = jax.random.PRNGKey(0)
    k1, k2 = jax.random.split(key)

    batch = 200          # deliberately not a multiple of 128 -> exercises lane padding/masking
    num_classes = 8      # matches the 8-entry class-weight vector in the module

    # Deterministic class weights from the module's __init__.
    weight = jnp.array(
        [1.0, 3061 / 669, 3061 / 105, 3061 / 2868,
         3061 / 219, 3061 / 61, 3061 / 653, 3061 / 230],
        dtype=jnp.float32,
    )

    preds = jax.random.normal(k1, (batch, num_classes), dtype=jnp.float32)
    target = jax.random.randint(k2, (batch,), 0, num_classes, dtype=jnp.int32)

    ref = _reference(preds, target, weight, smoothing=0.1)

    # Single-tile path (default tile size).
    out = label_smoothing_loss(preds, target, weight, smoothing=0.1)
    out = jax.block_until_ready(out)
    assert jnp.allclose(out, ref, rtol=1e-5, atol=1e-5), (out, ref)

    # Multi-step grid path (small tile -> exercises the running-sum accumulators).
    out_tiled = label_smoothing_loss(preds, target, weight, smoothing=0.1, tile_n=128)
    out_tiled = jax.block_until_ready(out_tiled)
    assert jnp.allclose(out_tiled, ref, rtol=1e-5, atol=1e-5), (out_tiled, ref)

    print("KERNEL_OK")
</pallas_src>

<mosaic_0001>
module attributes {stable_mosaic.version = 11 : i64} {
  func.func @_label_smoothing_kernel(%arg0: i32, %arg1: memref<8x256xf32, #tpu.memory_space<vmem>>, %arg2: memref<1x256xi32, #tpu.memory_space<vmem>>, %arg3: memref<8x1xf32, #tpu.memory_space<vmem>>, %arg4: memref<1x1xf32, #tpu.memory_space<smem>>, %arg5: memref<3xf32, #tpu.memory_space<smem>>) attributes {dimension_semantics = [#tpu.dimension_semantics<arbitrary>], iteration_bounds = array<i64: 1>, scalar_prefetch = 0 : i64, scratch_operands = 1 : i64, tpu.core_type = #tpu.core_type<tc>, window_params = [{transform_indices = @transform_0, window_bounds = array<i64: 8, 256>}, {transform_indices = @transform_1, window_bounds = array<i64: 1, 256>}, {pipeline_mode = #tpu.pipeline_mode<synchronous>, transform_indices = @transform_2, window_bounds = array<i64: 8, 1>}, {transform_indices = @transform_3, window_bounds = array<i64: 1, 1>}]} {
    %c0_i32 = arith.constant 0 : i32
    %0 = arith.cmpi eq, %arg0, %c0_i32 : i32
    %1 = arith.extui %0 : i1 to i32
    %c0_i32_0 = arith.constant 0 : i32
    %2 = arith.cmpi ne, %1, %c0_i32_0 : i32
    scf.if %2 {
      %cst_22 = arith.constant 0.000000e+00 : f32
      %c0_23 = arith.constant 0 : index
      %71 = memref.load %arg5[%c0_23] : memref<3xf32, #tpu.memory_space<smem>>
      memref.store %cst_22, %arg5[%c0_23] : memref<3xf32, #tpu.memory_space<smem>>
      %cst_24 = arith.constant 0.000000e+00 : f32
      %c1_25 = arith.constant 1 : index
      %72 = memref.load %arg5[%c1_25] : memref<3xf32, #tpu.memory_space<smem>>
      memref.store %cst_24, %arg5[%c1_25] : memref<3xf32, #tpu.memory_space<smem>>
      %cst_26 = arith.constant 0.000000e+00 : f32
      %c2_27 = arith.constant 2 : index
      %73 = memref.load %arg5[%c2_27] : memref<3xf32, #tpu.memory_space<smem>>
      memref.store %cst_26, %arg5[%c2_27] : memref<3xf32, #tpu.memory_space<smem>>
    } else {
    }
    %c0 = arith.constant 0 : index
    %c0_1 = arith.constant 0 : index
    %3 = vector.load %arg1[%c0, %c0_1] : memref<8x256xf32, #tpu.memory_space<vmem>>, vector<8x256xf32>
    %c0_2 = arith.constant 0 : index
    %c0_3 = arith.constant 0 : index
    %4 = vector.load %arg2[%c0_2, %c0_3] : memref<1x256xi32, #tpu.memory_space<vmem>>, vector<1x256xi32>
    %c0_4 = arith.constant 0 : index
    %c0_5 = arith.constant 0 : index
    %5 = vector.load %arg3[%c0_4, %c0_5] : memref<8x1xf32, #tpu.memory_space<vmem>>, vector<8x1xf32>
    %6 = tpu.iota {dimensions = array<i32: 1>} : vector<1x256xi32>
    %c256_i32 = arith.constant 256 : i32
    %7 = arith.muli %arg0, %c256_i32 : i32
    %8 = vector.broadcast %7 : i32 to vector<1x256xi32>
    %9 = arith.addi %6, %8 : vector<1x256xi32>
    %c200_i32 = arith.constant 200 : i32
    %10 = vector.broadcast %c200_i32 : i32 to vector<1x256xi32>
    %11 = arith.cmpi slt, %9, %10 : vector<1x256xi32>
    %12 = arith.extui %11 : vector<1x256xi1> to vector<1x256xi32>
    %13 = arith.sitofp %12 : vector<1x256xi32> to vector<1x256xf32>
    %cst = arith.constant dense<0xFF800000> : vector<256xf32>
    %14 = vector.multi_reduction <maximumf>, %3, %cst [0] : vector<8x256xf32> to vector<256xf32>
    %15 = vector.shape_cast %14 : vector<256xf32> to vector<1x256xf32>
    %16 = vector.broadcast %15 : vector<1x256xf32> to vector<8x256xf32>
    %17 = arith.subf %3, %16 : vector<8x256xf32>
    %18 = math.exp %17 : vector<8x256xf32>
    %cst_6 = arith.constant dense<0.000000e+00> : vector<256xf32>
    %19 = vector.multi_reduction <add>, %18, %cst_6 [0] : vector<8x256xf32> to vector<256xf32>
    %20 = vector.shape_cast %19 : vector<256xf32> to vector<1x256xf32>
    %21 = math.log %20 : vector<1x256xf32>
    %cst_7 = arith.constant dense<0.000000e+00> : vector<256xf32>
    %22 = vector.multi_reduction <add>, %3, %cst_7 [0] : vector<8x256xf32> to vector<256xf32>
    %23 = vector.shape_cast %22 : vector<256xf32> to vector<1x256xf32>
    %24 = arith.addf %15, %21 : vector<1x256xf32>
    %cst_8 = arith.constant 8.000000e+00 : f32
    %25 = vector.broadcast %cst_8 : f32 to vector<1x256xf32>
    %26 = arith.mulf %25, %24 : vector<1x256xf32>
    %27 = arith.subf %26, %23 : vector<1x256xf32>
    %28 = tpu.iota {dimensions = array<i32: 0>} : vector<8x256xi32>
    %29 = vector.broadcast %4 : vector<1x256xi32> to vector<8x256xi32>
    %30 = arith.cmpi eq, %28, %29 : vector<8x256xi32>
    %cst_9 = arith.constant 0.000000e+00 : f32
    %31 = vector.broadcast %cst_9 : f32 to vector<8x256xf32>
    %32 = arith.select %30, %3, %31 : vector<8x256xi1>, vector<8x256xf32>
    %cst_10 = arith.constant dense<0.000000e+00> : vector<256xf32>
    %33 = vector.multi_reduction <add>, %32, %cst_10 [0] : vector<8x256xf32> to vector<256xf32>
    %34 = vector.shape_cast %33 : vector<256xf32> to vector<1x256xf32>
    %cst_11 = arith.constant 0.000000e+00 : f32
    %35 = vector.shape_cast %5 : vector<8x1xf32> to vector<8x1xf32>
    %36 = vector.broadcast %35 : vector<8x1xf32> to vector<8x256xf32>
    %37 = vector.broadcast %cst_11 : f32 to vector<8x256xf32>
    %38 = arith.select %30, %36, %37 : vector<8x256xi1>, vector<8x256xf32>
    %cst_12 = arith.constant dense<0.000000e+00> : vector<256xf32>
    %39 = vector.multi_reduction <add>, %38, %cst_12 [0] : vector<8x256xf32> to vector<256xf32>
    %40 = vector.shape_cast %39 : vector<256xf32> to vector<1x256xf32>
    %41 = arith.addf %15, %21 : vector<1x256xf32>
    %42 = arith.subf %41, %34 : vector<1x256xf32>
    %c0_13 = arith.constant 0 : index
    %43 = memref.load %arg5[%c0_13] : memref<3xf32, #tpu.memory_space<smem>>
    %44 = arith.mulf %27, %13 : vector<1x256xf32>
    %45 = vector.shape_cast %44 : vector<1x256xf32> to vector<1x1x256xf32>
    %cst_14 = arith.constant dense<0.000000e+00> : vector<1xf32>
    %46 = vector.multi_reduction <add>, %45, %cst_14 [1, 2] : vector<1x1x256xf32> to vector<1xf32>
    %47 = vector.shape_cast %46 : vector<1xf32> to vector<1x1x1xf32>
    %48 = vector.extract %47[0, 0, 0] : f32 from vector<1x1x1xf32>
    %49 = arith.addf %43, %48 : f32
    %c0_15 = arith.constant 0 : index
    %50 = memref.load %arg5[%c0_15] : memref<3xf32, #tpu.memory_space<smem>>
    memref.store %49, %arg5[%c0_15] : memref<3xf32, #tpu.memory_space<smem>>
    %c1 = arith.constant 1 : index
    %51 = memref.load %arg5[%c1] : memref<3xf32, #tpu.memory_space<smem>>
    %52 = arith.mulf %40, %42 : vector<1x256xf32>
    %53 = arith.mulf %52, %13 : vector<1x256xf32>
    %54 = vector.shape_cast %53 : vector<1x256xf32> to vector<1x1x256xf32>
    %cst_16 = arith.constant dense<0.000000e+00> : vector<1xf32>
    %55 = vector.multi_reduction <add>, %54, %cst_16 [1, 2] : vector<1x1x256xf32> to vector<1xf32>
    %56 = vector.shape_cast %55 : vector<1xf32> to vector<1x1x1xf32>
    %57 = vector.extract %56[0, 0, 0] : f32 from vector<1x1x1xf32>
    %58 = arith.addf %51, %57 : f32
    %c1_17 = arith.constant 1 : index
    %59 = memref.load %arg5[%c1_17] : memref<3xf32, #tpu.memory_space<smem>>
    memref.store %58, %arg5[%c1_17] : memref<3xf32, #tpu.memory_space<smem>>
    %c2 = arith.constant 2 : index
    %60 = memref.load %arg5[%c2] : memref<3xf32, #tpu.memory_space<smem>>
    %61 = arith.mulf %40, %13 : vector<1x256xf32>
    %62 = vector.shape_cast %61 : vector<1x256xf32> to vector<1x1x256xf32>
    %cst_18 = arith.constant dense<0.000000e+00> : vector<1xf32>
    %63 = vector.multi_reduction <add>, %62, %cst_18 [1, 2] : vector<1x1x256xf32> to vector<1xf32>
    %64 = vector.shape_cast %63 : vector<1xf32> to vector<1x1x1xf32>
    %65 = vector.extract %64[0, 0, 0] : f32 from vector<1x1x1xf32>
    %66 = arith.addf %60, %65 : f32
    %c2_19 = arith.constant 2 : index
    %67 = memref.load %arg5[%c2_19] : memref<3xf32, #tpu.memory_space<smem>>
    memref.store %66, %arg5[%c2_19] : memref<3xf32, #tpu.memory_space<smem>>
    %c0_i32_20 = arith.constant 0 : i32
    %68 = arith.cmpi eq, %arg0, %c0_i32_20 : i32
    %69 = arith.extui %68 : i1 to i32
    %c0_i32_21 = arith.constant 0 : i32
    %70 = arith.cmpi ne, %69, %c0_i32_21 : i32
    scf.if %70 {
      %c0_22 = arith.constant 0 : index
      %71 = memref.load %arg5[%c0_22] : memref<3xf32, #tpu.memory_space<smem>>
      %cst_23 = arith.constant 2.000000e+02 : f32
      %72 = arith.divf %71, %cst_23 : f32
      %c1_24 = arith.constant 1 : index
      %73 = memref.load %arg5[%c1_24] : memref<3xf32, #tpu.memory_space<smem>>
      %c2_25 = arith.constant 2 : index
      %74 = memref.load %arg5[%c2_25] : memref<3xf32, #tpu.memory_space<smem>>
      %75 = arith.divf %73, %74 : f32
      %cst_26 = arith.constant 8.000000e+00 : f32
      %76 = arith.divf %72, %cst_26 : f32
      %cst_27 = arith.constant 1.000000e-01 : f32
      %77 = arith.mulf %cst_27, %76 : f32
      %cst_28 = arith.constant 0.899999976 : f32
      %78 = arith.mulf %cst_28, %75 : f32
      %79 = arith.addf %77, %78 : f32
      %c0_29 = arith.constant 0 : index
      %c0_30 = arith.constant 0 : index
      %80 = memref.load %arg4[%c0_29, %c0_30] : memref<1x1xf32, #tpu.memory_space<smem>>
      memref.store %79, %arg4[%c0_29, %c0_30] : memref<1x1xf32, #tpu.memory_space<smem>>
    } else {
    }
    return
  }
  func.func @transform_0(%arg0: i32) -> (i32, i32) {
    %c0_i32 = arith.constant 0 : i32
    %c0_i32_0 = arith.constant 0 : i32
    return %c0_i32, %arg0 : i32, i32
  }
  func.func @transform_1(%arg0: i32) -> (i32, i32) {
    %c0_i32 = arith.constant 0 : i32
    %c0_i32_0 = arith.constant 0 : i32
    return %c0_i32, %arg0 : i32, i32
  }
  func.func @transform_2(%arg0: i32) -> (i32, i32) {
    %c0_i32 = arith.constant 0 : i32
    %c0_i32_0 = arith.constant 0 : i32
    %c0_i32_1 = arith.constant 0 : i32
    return %c0_i32, %c0_i32_0 : i32, i32
  }
  func.func @transform_3(%arg0: i32) -> (i32, i32) {
    %c0_i32 = arith.constant 0 : i32
    %c0_i32_0 = arith.constant 0 : i32
    %c0_i32_1 = arith.constant 0 : i32
    return %c0_i32, %c0_i32_0 : i32, i32
  }
}

</mosaic_0001>

<bundles_post_ra>
// kernel: tpu_custom_call.1
= control target key start
LH: loop header
LB: loop body
LE: loop exit
PB: predicated region body
PF: predicated region fallthrough
CT: control target
= control target key end

     0   :  { %8 = vsyncpa [#allocation4], 0  ;;  %s375_s0 = inlined_call_operand.hbm [shape: f32[8,256], index: 0, kind: input, shape index: {}]   ;;  %s376_s1 = inlined_call_operand.vmem [shape: s32[1,256], index: 1, kind: input, shape index: {}]   ;;  %s377_s2 = inlined_call_operand.vmem [shape: f32[8,1], index: 2, kind: input, shape index: {}]   ;;  %s378_s3 = inlined_call_operand.hbm [shape: f32[1,1], index: 3, kind: output, shape index: {}]  }
   0x1   :  { %9 = vsyncpa [#allocation5], 0  ;;  %s305_s12 = smov [#allocation3]  }
   0x2   :  { %s16_s13 = sshll.u32 %s305_s12, 4  ;;  %s17_s13 = int_to_ptr.vmem [resolvable:$true] %s16_s13 }
   0x3   :  { %s281_s14 = scalar_lea.vmem %s17_s13, 256  ;;  %p286_p1 = scmp.lt.s32.totalorder %s17_s13, %s17_s13 }
   0x4   :  { %p282_p0 = scmp.ne.s32.totalorder %s17_s13, %s281_s14  ;;  %p287_p2 = scmp.lt.s32.totalorder %s281_s14, %s281_s14 }
   0x6   :  { %p288_p3 = por %p287_p2, %p286_p1 }
   0x8   :  { %p289_p4 = pnand %p288_p3, %p282_p0 }
   0xa   :  { %292 = shalt.err (!%p289_p4)
}
   0xb   :  { %19 = dma.hbm_to_vmem [thread:$0]  %s375_s0, 256, %s17_s13, [#allocation4]  }
   0xc   :  { %301 = dma.done.wait [#allocation4], 256  }
   0xd   :  { %302 = vsyncadd [#allocation4], 4294967040  ;;  %v306_v0 = vmov 0   ;;  %v40_v1 = vld [vmem:[%s377_s2] sm:$0xff]  ;;  %v38_v3 = vld [vmem:[#allocation3 + $0x8] sm:$0xff]  ;;  %v41_v18 = vlaneseq  ;;  %vm156_vm3 = vcmask 1040384  }
   0xe   :  { %262 = vset.pattern.permute.xlu0 %v306_v0  ;;  %v37_v2 = vld [vmem:[#allocation3] sm:$0xff]  ;;  %v60_v5 = vrot.slane %v38_v3, 4  ;;  %s308_s28 = smov [#allocation6]  }
   0xf   :  { %134 = vperm.xlu0 %262, %v40_v1   ;;  %v54_v4 = vrot.slane %v37_v2, 4  ;;  %v338_v21 = vshrl.u32 %v41_v18, 7  ;;  %v39_v24 = vld [vmem:[%s376_s1] sm:$0x3]  ;;  %v42_v56 = vand.u32 127, %v41_v18 }
  0x10   :  { %v61_v7 = vmax.f32 %v38_v3, %v60_v5  ;;  %v95_v48 = vadd.f32 %v60_v5, %v38_v3 }
  0x11   :  { %v55_v6 = vmax.f32 %v37_v2, %v54_v4  ;;  %v110_v22 = vsub.s32 0, %v338_v21  ;;  %v114_v23 = vsub.s32 1, %v338_v21  ;;  %v89_v47 = vadd.f32 %v54_v4, %v37_v2 }
  0x12   :  { %v62_v9 = vrot.slane %v61_v7, 2  ;;  %v96_v52 = vrot.slane %v95_v48, 2  ;;  %v43_v62 = vadd.s32 128, %v42_v56 }
  0x13   :  { %v56_v8 = vrot.slane %v55_v6, 2  ;;  %v345_v25 = vrot.slane %v39_v24, %v110_v22  ;;  %v347_v26 = vrot.slane %v39_v24, %v114_v23  ;;  %v90_v51 = vrot.slane %v89_v47, 2 }
  0x14   :  { %v63_v11 = vmax.f32 %v61_v7, %v62_v9  ;;  %v97_v57 = vadd.f32 %v96_v52, %v95_v48  ;;  %vm49_vm2 = vcmp.lt.s32.totalorder %v43_v62, 200 }
  0x15   :  { %v57_v10 = vmax.f32 %v55_v6, %v56_v8  ;;  %vm116_vm0 = vcmp.eq.s32.totalorder %v338_v21, %v345_v25  ;;  %vm117_vm1 = vcmp.eq.s32.totalorder %v338_v21, %v347_v26  ;;  %v91_v55 = vadd.f32 %v90_v51, %v89_v47 }
  0x16   :  { %v64_v13 = vrot.slane %v63_v11, 1  ;;  %v118_v32 = vsel %vm116_vm0, %v37_v2, 0.0  ;;  %v119_v34 = vsel %vm117_vm1, %v38_v3, 0.0  ;;  %v98_v63 = vrot.slane %v97_v57, 1 }
  0x17   :  { %v58_v12 = vrot.slane %v57_v10, 1  ;;  %v120_v37 = vrot.slane %v118_v32, 4  ;;  %v126_v39 = vrot.slane %v119_v34, 4  ;;  %v92_v60 = vrot.slane %v91_v55, 1 }
  0x18   :  { %v335_v15 = vmax.f32 %v63_v11, %v64_v13  ;;  %v99_v7 = vadd.f32 %v98_v63, %v97_v57  ;;  %v307_v13 = vmov 0.0  }
  0x19   :  { %v59_v14 = vmax.f32 %v57_v10, %v58_v12  ;;  %v121_v43 = vadd.f32 %v120_v37, %v118_v32  ;;  %v127_v45 = vadd.f32 %v126_v39, %v119_v34  ;;  %v93_v5 = vadd.f32 %v92_v60, %v91_v55 }
  0x1a   :  { %v67_v17 = vsub.f32 %v38_v3, %v335_v15 }
  0x1b   :  { %v66_v16 = vsub.f32 %v37_v2, %v59_v14  ;;  %v122_v49 = vrot.slane %v121_v43, 2  ;;  %v128_v50 = vrot.slane %v127_v45, 2 }
  0x1c   :  { %v70_v20 = vmul.f32 1.442695, %v67_v17 }
  0x1d   :  { %v68_v19 = vmul.f32 1.442695, %v66_v16  ;;  %v123_v53 = vadd.f32 %v122_v49, %v121_v43  ;;  %v129_v54 = vadd.f32 %v128_v50, %v127_v45  ;;  %v245_v16 = vsel %vm49_vm2, 1.0, %v307_v13 }
  0x1f   :  { %263 = vpow2.f32 %v68_v19  ;;  %v124_v58 = vrot.slane %v123_v53, 1  ;;  %v130_v59 = vrot.slane %v129_v54, 1 }
  0x20   :  { %265 = vpow2.f32 %v70_v20 }
  0x21   :  { %v125_v2 = vadd.f32 %v124_v58, %v123_v53  ;;  %v131_v4 = vadd.f32 %v130_v59, %v129_v54 }
  0x2c   :  { %v264_v27 = vpop.eup %263 }
  0x2d   :  { %v266_v28 = vpop.eup %265  ;;  %v72_v29 = vrot.slane %v264_v27, 4 }
  0x2e   :  { %v78_v30 = vrot.slane %v266_v28, 4 }
  0x2f   :  { %v73_v31 = vadd.f32 %v264_v27, %v72_v29 }
  0x30   :  { %v79_v33 = vadd.f32 %v266_v28, %v78_v30 }
  0x31   :  { %v74_v35 = vrot.slane %v73_v31, 2 }
  0x32   :  { %v80_v36 = vrot.slane %v79_v33, 2 }
  0x33   :  { %v75_v38 = vadd.f32 %v74_v35, %v73_v31 }
  0x34   :  { %v81_v40 = vadd.f32 %v80_v36, %v79_v33 }
  0x35   :  { %v76_v41 = vrot.slane %v75_v38, 1 }
  0x36   :  { %v82_v42 = vrot.slane %v81_v40, 1 }
  0x37   :  { %v77_v44 = vadd.f32 %v76_v41, %v75_v38 }
  0x38   :  { %v83_v46 = vadd.f32 %v82_v42, %v81_v40 }
  0x39   :  { %267 = vlog2.f32 %v77_v44 }
  0x3a   :  { %269 = vlog2.f32 %v83_v46 }
  0x46   :  { %v268_v61 = vpop.eup %267 }
  0x47   :  { %v270_v0 = vpop.eup %269  ;;  %v85_v1 = vmul.f32 0.6931472, %v268_v61 }
  0x48   :  { %v87_v3 = vmul.f32 0.6931472, %v270_v0 }
  0x49   :  { %v100_v6 = vadd.f32 %v85_v1, %v59_v14 }
  0x4a   :  { %v101_v8 = vadd.f32 %v87_v3, %v335_v15 }
  0x4b   :  { %v102_v9 = vmul.f32 8.0, %v100_v6  ;;  %v151_v10 = vsub.f32 %v100_v6, %v125_v2 }
  0x4c   :  { %v103_v11 = vmul.f32 8.0, %v101_v8  ;;  %v152_v12 = vsub.f32 %v101_v8, %v131_v4 }
  0x4d   :  { %v104_v17 = vsub.f32 %v102_v9, %v93_v5 }
  0x4e   :  { %v105_v18 = vsub.f32 %v103_v11, %v99_v7 }
  0x4f   :  { %v157_v20 = vsel %vm156_vm3, %v104_v17, 0.0 }
  0x50   :  { %v155_v19 = vmul.f32 %v245_v16, %v105_v18 }
  0x52   :  { %v158_v22 = vsel %vm156_vm3, %v155_v19, 0.0 }
  0x53   :  { %v159_v23 = vadd.f32 %v158_v22, %v157_v20 }
  0x55   :  { %160 = vadd.xlane.f32.xlu0 %v159_v23 }
  0x8a   :  { %v135_v14 = vpop.permute.xlu0 %134 }
  0x8b   :  { %v137_v15 = vsel %vm116_vm0, %v135_v14, 0.0  ;;  %v138_v24 = vsel %vm117_vm1, %v135_v14, 0.0 }
  0x8c   :  { %v139_v27 = vrot.slane %v137_v15, 4  ;;  %v145_v28 = vrot.slane %v138_v24, 4 }
  0x8e   :  { %v140_v29 = vadd.f32 %v139_v27, %v137_v15  ;;  %v146_v30 = vadd.f32 %v145_v28, %v138_v24 }
  0x90   :  { %v141_v31 = vrot.slane %v140_v29, 2  ;;  %v147_v32 = vrot.slane %v146_v30, 2 }
  0x92   :  { %v142_v33 = vadd.f32 %v141_v31, %v140_v29  ;;  %v148_v34 = vadd.f32 %v147_v32, %v146_v30 }
  0x94   :  { %v143_v35 = vrot.slane %v142_v33, 1  ;;  %v149_v36 = vrot.slane %v148_v34, 1 }
  0x96   :  { %v150_v37 = vadd.f32 %v149_v36, %v148_v34  ;;  %v144_v38 = vadd.f32 %v143_v35, %v142_v33 }
  0x98   :  { %v173_v39 = vmul.f32 %v151_v10, %v144_v38  ;;  %v174_v40 = vmul.f32 %v152_v12, %v150_v37  ;;  %v194_v41 = vmul.f32 %v245_v16, %v150_v37  ;;  %v195_v44 = vsel %vm156_vm3, %v144_v38, 0.0 }
  0x9a   :  { %v176_v25 = vmul.f32 %v245_v16, %v174_v40  ;;  %v177_v42 = vsel %vm156_vm3, %v173_v39, 0.0  ;;  %v196_v43 = vsel %vm156_vm3, %v194_v41, 0.0 }
  0x9b   :  { %v197_v45 = vadd.f32 %v196_v43, %v195_v44 }
  0x9c   :  { %v178_v21 = vsel %vm156_vm3, %v176_v25, 0.0 }
  0x9d   :  { %v179_v26 = vadd.f32 %v178_v21, %v177_v42 }
  0x9f   :  { %180 = vadd.xlane.f32.xlu1 %v179_v26 }
  0xa3   :  { %198 = vadd.xlane.f32.xlu1 %v197_v45 }
  0xde   :  { %v161_v46 = vpop.xlane.xlu0 %160 }
  0xdf   :  { %v162_v47 = vrot.slane %v161_v46, 4 }
  0xe1   :  { %v163_v48 = vadd.f32 %v162_v47, %v161_v46 }
  0xe3   :  { %v164_v49 = vrot.slane %v163_v48, 2 }
  0xe5   :  { %v165_v50 = vadd.f32 %v164_v49, %v163_v48 }
  0xe7   :  { %v166_v51 = vrot.slane %v165_v50, 1 }
  0xe9   :  { %v167_v52 = vadd.f32 %v166_v51, %v165_v50 }
  0xeb   :  { %250 = vpush %v167_v52 }
 0x11c   :  { %s251_s1 = spop %250 }
 0x11d   :  { %s216_s21 = smul.f32 0.005, %s251_s1 }
 0x11f   :  { %s225_s22 = smul.f32 0.125, %s216_s21 }
 0x121   :  { %s226_s25 = smul.f32 0.1, %s225_s22 }
 0x128   :  { %v181_v53 = vpop.xlane.xlu1 %180 }
 0x129   :  { %v182_v54 = vrot.slane %v181_v53, 4 }
 0x12b   :  { %v183_v55 = vadd.f32 %v182_v54, %v181_v53 }
 0x12c   :  { %v199_v56 = vpop.xlane.xlu1 %198 }
 0x12d   :  { %v184_v57 = vrot.slane %v183_v55, 2  ;;  %v200_v58 = vrot.slane %v199_v56, 4 }
 0x12f   :  { %v201_v59 = vadd.f32 %v200_v58, %v199_v56  ;;  %v185_v60 = vadd.f32 %v184_v57, %v183_v55 }
 0x131   :  { %v202_v61 = vrot.slane %v201_v59, 2  ;;  %v186_v62 = vrot.slane %v185_v60, 1 }
 0x133   :  { %v203_v63 = vadd.f32 %v202_v61, %v201_v59  ;;  %v187_v0 = vadd.f32 %v186_v62, %v185_v60 }
 0x135   :  { %252 = vpush %v187_v0  ;;  %v204_v1 = vrot.slane %v203_v63, 1 }
 0x137   :  { %v205_v2 = vadd.f32 %v204_v1, %v203_v63 }
 0x139   :  { %254 = vpush %v205_v2 }
 0x166   :  { %s253_s19 = spop %252 }
 0x16a   :  { %s255_s20 = spop %254 }
 0x16b   :  { %v219_v4 = vstv %s255_s20 }
 0x16c   :  { %271 = vrcp.f32 %v219_v4 }
 0x179   :  { %v272_v3 = vpop.eup %271 }
 0x17a   :  { %256 = vpush %v272_v3 }
 0x1ab   :  { %s257_s23 = spop %256 }
 0x1ac   :  { %s222_s24 = smul.f32 %s257_s23, %s253_s19 }
 0x1ae   :  { %s227_s26 = smul.f32 0.9, %s222_s24 }
 0x1b0   :  { %s228_s27 = sadd.f32 %s227_s26, %s226_s25 }
 0x1b2   :  { %230 = sst [smem:[#allocation6]] %s228_s27 }
 0x1b3   :  { %238 = dma.smem_to_hbm %s308_s28, 16, %s378_s3, [#allocation5]  }
 0x1b4   :  { %303 = dma.done.wait [#allocation5], 16  }
 0x1b5   :  { %304 = vsyncadd [#allocation5], 4294967280 }
 0x1b6   :  { %242 = sfence }
 0x1b7   :  { %243 = vsyncpa [#allocation4], 1 }
 0x1b8   :  { %244 = vsyncpa [#allocation5], 1 }

</bundles_post_ra>
